<compile_context>
chip_gen: v7x
topology: tpu7x:2x2x1
jax: 0.10.0
libtpu: 0.0.40
codegen_flags: <defaults>
</compile_context>

<pallas_src>
import functools
import math

import jax
import jax.numpy as jnp
from jax.experimental import pallas as pl
from jax.experimental.pallas import tpu as pltpu

SUBLANE = 8      # f32 sublane width
ALIGN = 16       # bf16 sublane tile -> align packed block row-starts to this


def _round_up(x, m):
    return ((x + m - 1) // m) * m


def init_linear_params(key, in_dim, out_dim):
    """PyTorch nn.Linear-like uniform fan_in init, (in, out) layout."""
    kw, kb = jax.random.split(key)
    bound = 1.0 / math.sqrt(in_dim)
    w = jax.random.uniform(kw, (in_dim, out_dim), jnp.float32, -bound, bound)
    b = jax.random.uniform(kb, (1, out_dim), jnp.float32, -bound, bound)
    return w, b


# ----------------------------------------------------------------------------
# Parameter packing: one contiguous bf16 buffer, static layout table
# ----------------------------------------------------------------------------
def init_phi_params(key, latent_dim, action_dim, bn_dim, feature_dim,
                    hidden_dim, hidden_depth):
    # TODO(synk): bn_dim=None (nn.Identity bottleneck) path not implemented.
    assert bn_dim is not None

    dims = [bn_dim + action_dim] + [hidden_dim] * hidden_depth + [feature_dim]
    n_rest = len(dims) - 2                      # layers after the first MLP layer
    col_width = max(bn_dim, *dims[1:])          # packed buffer column width

    keys = jax.random.split(key, hidden_depth + 2)
    blocks = []                                 # (name, (rows, cols) f32 array)

    # Bottleneck: Linear(latent, bn) + LayerNorm(bn)
    w, b = init_linear_params(keys[0], latent_dim, bn_dim)
    blocks += [("bn_w", w), ("bn_b", b),
               ("ln_g", jnp.ones((1, bn_dim), jnp.float32)),
               ("ln_b", jnp.zeros((1, bn_dim), jnp.float32))]

    # First MLP layer, split into bottleneck-rows and action-rows (folds concat).
    w0, b0 = init_linear_params(keys[1], dims[0], dims[1])
    blocks += [("w0_top", w0[:bn_dim, :]), ("w0_bot", w0[bn_dim:, :]), ("b0", b0)]

    # Remaining MLP layers (ReLU on hidden, none on output layer).
    for i in range(1, len(dims) - 1):
        w, b = init_linear_params(keys[1 + i], dims[i], dims[i + 1])
        blocks += [(f"w{i}", w), (f"b{i}", b)]

    layout = {}
    pieces = []
    row = 0
    for name, arr in blocks:
        r, c = arr.shape
        layout[name] = (row, r, c)              # static (offset, rows, cols)
        rp = _round_up(r, ALIGN)                # sublane-aligned block starts
        pieces.append(jnp.pad(arr, ((0, rp - r), (0, col_width - c))))
        row += rp
    packed = jnp.concatenate(pieces, axis=0).astype(jnp.bfloat16)

    cfg = dict(latent_dim=latent_dim, action_dim=action_dim, bn_dim=bn_dim,
               feature_dim=feature_dim, dims=dims, n_rest=n_rest, layout=layout)
    return packed, cfg


# ----------------------------------------------------------------------------
# Fused kernel: bottleneck (Linear -> LayerNorm -> Tanh) + full MLP
# ----------------------------------------------------------------------------
def _phi_fused_kernel(state_ref, action_ref, p_ref, o_ref, *,
                      layout, n_rest, eps):
    f32, bf16 = jnp.float32, jnp.bfloat16

    def param(name):
        off, r, c = layout[name]                # static slice -> free view
        return p_ref[off:off + r, 0:c]

    state = state_ref[...].astype(bf16)
    action = action_ref[...].astype(bf16)

    # ---- bottleneck: Linear -> LayerNorm(bn_dim) -> Tanh ---------------------
    h = jnp.dot(state, param("bn_w"), preferred_element_type=f32)
    h = h + param("bn_b").astype(f32)
    mean = jnp.mean(h, axis=-1, keepdims=True)
    centered = h - mean
    var = jnp.mean(centered * centered, axis=-1, keepdims=True)
    hn = centered * jax.lax.rsqrt(var + eps)
    hn = hn * param("ln_g").astype(f32) + param("ln_b").astype(f32)
    t = jnp.tanh(hn).astype(bf16)

    # ---- first MLP layer: concat([t, action]) folded into a split matmul -----
    y = (jnp.dot(t, param("w0_top"), preferred_element_type=f32)
         + jnp.dot(action, param("w0_bot"), preferred_element_type=f32)
         + param("b0").astype(f32))
    if n_rest > 0:
        y = jnp.maximum(y, 0.0)

    # ---- remaining MLP layers (ReLU on hidden, none on the output layer) -----
    for i in range(1, n_rest + 1):
        y = (jnp.dot(y.astype(bf16), param(f"w{i}"), preferred_element_type=f32)
             + param(f"b{i}").astype(f32))
        if i < n_rest:
            y = jnp.maximum(y, 0.0)

    o_ref[...] = y.astype(o_ref.dtype)


# ----------------------------------------------------------------------------
# Wrapper: single pallas_call, 1-D batch-tiled parallel grid, resident weights
# ----------------------------------------------------------------------------
def phi_forward(packed, cfg, current_state, current_action, tb=None):
    B, latent_dim = current_state.shape
    action_dim = current_action.shape[1]
    feature_dim = cfg["feature_dim"]
    dims = cfg["dims"]

    Bp = _round_up(B, SUBLANE)
    if tb is None:
        tb = 256 if Bp >= 256 else Bp           # fill MXU rows at large batch
    Bp = _round_up(Bp, tb)

    state, action = current_state, current_action
    if Bp != B:
        state = jnp.pad(state, ((0, Bp - B), (0, 0)))
        action = jnp.pad(action, ((0, Bp - B), (0, 0)))

    # Advisory cost estimate for XLA scheduling.
    flops = 2 * Bp * latent_dim * cfg["bn_dim"]
    for i in range(len(dims) - 1):
        flops += 2 * Bp * dims[i] * dims[i + 1]
    bytes_accessed = (state.size * 4 + action.size * 4
                      + packed.size * 2 + Bp * feature_dim * 4)
    cost = pl.CostEstimate(flops=int(flops),
                           transcendentals=int(Bp * cfg["bn_dim"] + Bp),
                           bytes_accessed=int(bytes_accessed))

    kernel = functools.partial(_phi_fused_kernel, layout=cfg["layout"],
                               n_rest=cfg["n_rest"], eps=1e-5)

    out = pl.pallas_call(
        kernel,
        out_shape=jax.ShapeDtypeStruct((Bp, feature_dim), jnp.float32),
        grid=(Bp // tb,),
        in_specs=[
            pl.BlockSpec((tb, latent_dim), lambda i: (i, 0)),
            pl.BlockSpec((tb, action_dim), lambda i: (i, 0)),
            pl.BlockSpec(packed.shape, lambda i: (0, 0)),   # VMEM-resident params
        ],
        out_specs=pl.BlockSpec((tb, feature_dim), lambda i: (i, 0)),
        compiler_params=pltpu.CompilerParams(dimension_semantics=("parallel",)),
        cost_estimate=cost,
    )(state, action, packed)

    return out[:B]


# ----------------------------------------------------------------------------
# Pure-JAX reference (mirrors bf16 weight storage + bf16 matmul operands)
# ----------------------------------------------------------------------------
def phi_reference(packed, cfg, state, action, eps=1e-5):
    layout = cfg["layout"]
    n_rest = cfg["n_rest"]

    def get(name):
        off, r, c = layout[name]
        return packed[off:off + r, :c].astype(jnp.float32)

    def q(x):  # mirror kernel's bf16 cast of matmul operands
        return x.astype(jnp.bfloat16).astype(jnp.float32)

    h = q(state) @ get("bn_w") + get("bn_b")
    mean = jnp.mean(h, axis=-1, keepdims=True)
    var = jnp.mean((h - mean) ** 2, axis=-1, keepdims=True)
    hn = (h - mean) * jax.lax.rsqrt(var + eps)
    hn = hn * get("ln_g") + get("ln_b")
    t = q(jnp.tanh(hn))
    y = t @ get("w0_top") + q(action) @ get("w0_bot") + get("b0")
    if n_rest > 0:
        y = jnp.maximum(y, 0.0)
    for i in range(1, n_rest + 1):
        y = q(y) @ get(f"w{i}") + get(f"b{i}")
        if i < n_rest:
            y = jnp.maximum(y, 0.0)
    return y


# ----------------------------------------------------------------------------
# Main
# ----------------------------------------------------------------------------
if __name__ == "__main__":
    latent_dim = 32
    action_dim = 16
    bn_dim = 16
    feature_dim = 32
    hidden_dim = 32
    hidden_depth = 2
    batch = 8

    key = jax.random.PRNGKey(0)
    k_params, k_state, k_action = jax.random.split(key, 3)

    packed, cfg = init_phi_params(k_params, latent_dim, action_dim, bn_dim,
                                  feature_dim, hidden_dim, hidden_depth)

    current_state = jax.random.normal(k_state, (batch, latent_dim), jnp.float32)
    current_action = jax.random.normal(k_action, (batch, action_dim), jnp.float32)

    out = phi_forward(packed, cfg, current_state, current_action)
    out = jax.block_until_ready(out)
    assert out.shape == (batch, feature_dim)

    ref = phi_reference(packed, cfg, current_state, current_action)
    max_err = float(jnp.max(jnp.abs(out - ref)))
    assert max_err < 1e-2, f"mismatch vs reference: {max_err}"

    print("KERNEL_OK")
</pallas_src>

<mosaic_0001>
module attributes {stable_mosaic.version = 11 : i64} {
  func.func @_phi_fused_kernel(%arg0: i32, %arg1: memref<8x32xf32, #tpu.memory_space<vmem>>, %arg2: memref<8x16xf32, #tpu.memory_space<vmem>>, %arg3: memref<224x32xbf16, #tpu.memory_space<vmem>>, %arg4: memref<8x32xf32, #tpu.memory_space<vmem>>) attributes {dimension_semantics = [#tpu.dimension_semantics<parallel>], iteration_bounds = array<i64: 1>, scalar_prefetch = 0 : i64, scratch_operands = 0 : i64, tpu.core_type = #tpu.core_type<tc>, window_params = [{transform_indices = @transform_0, window_bounds = array<i64: 8, 32>}, {transform_indices = @transform_1, window_bounds = array<i64: 8, 16>}, {pipeline_mode = #tpu.pipeline_mode<synchronous>, transform_indices = @transform_2, window_bounds = array<i64: 224, 32>}, {transform_indices = @transform_3, window_bounds = array<i64: 8, 32>}]} {
    %c0 = arith.constant 0 : index
    %c0_0 = arith.constant 0 : index
    %0 = vector.load %arg1[%c0, %c0_0] : memref<8x32xf32, #tpu.memory_space<vmem>>, vector<8x32xf32>
    %1 = arith.truncf %0 : vector<8x32xf32> to vector<8x32xbf16>
    %c0_1 = arith.constant 0 : index
    %c0_2 = arith.constant 0 : index
    %2 = vector.load %arg2[%c0_1, %c0_2] : memref<8x16xf32, #tpu.memory_space<vmem>>, vector<8x16xf32>
    %3 = arith.truncf %2 : vector<8x16xf32> to vector<8x16xbf16>
    %c0_3 = arith.constant 0 : index
    %c0_4 = arith.constant 0 : index
    %4 = vector.load %arg3[%c0_3, %c0_4] : memref<224x32xbf16, #tpu.memory_space<vmem>>, vector<32x16xbf16>
    %cst = arith.constant dense<0.000000e+00> : vector<8x16xf32>
    %5 = tpu.matmul %1, %4, %cst {dimension_numbers = #tpu.dot_dimension_numbers<[1], [0], [0], [1], [0, 0, 1, 1], [], []>} : vector<8x32xbf16>, vector<32x16xbf16>, vector<8x16xf32> -> vector<8x16xf32>
    %c32 = arith.constant 32 : index
    %c0_5 = arith.constant 0 : index
    %6 = vector.load %arg3[%c32, %c0_5] : memref<224x32xbf16, #tpu.memory_space<vmem>>, vector<1x16xbf16>
    %7 = arith.extf %6 : vector<1x16xbf16> to vector<1x16xf32>
    %8 = vector.broadcast %7 : vector<1x16xf32> to vector<8x16xf32>
    %9 = arith.addf %5, %8 : vector<8x16xf32>
    %cst_6 = arith.constant dense<0.000000e+00> : vector<8xf32>
    %10 = vector.multi_reduction <add>, %9, %cst_6 [1] : vector<8x16xf32> to vector<8xf32>
    %11 = vector.shape_cast %10 : vector<8xf32> to vector<8x1xf32>
    %cst_7 = arith.constant 1.600000e+01 : f32
    %12 = vector.broadcast %cst_7 : f32 to vector<8x1xf32>
    %13 = arith.divf %11, %12 : vector<8x1xf32>
    %14 = vector.broadcast %13 : vector<8x1xf32> to vector<8x16xf32>
    %15 = arith.subf %9, %14 : vector<8x16xf32>
    %16 = arith.mulf %15, %15 : vector<8x16xf32>
    %cst_8 = arith.constant dense<0.000000e+00> : vector<8xf32>
    %17 = vector.multi_reduction <add>, %16, %cst_8 [1] : vector<8x16xf32> to vector<8xf32>
    %18 = vector.shape_cast %17 : vector<8xf32> to vector<8x1xf32>
    %cst_9 = arith.constant 1.600000e+01 : f32
    %19 = vector.broadcast %cst_9 : f32 to vector<8x1xf32>
    %20 = arith.divf %18, %19 : vector<8x1xf32>
    %cst_10 = arith.constant 9.99999974E-6 : f32
    %21 = vector.broadcast %cst_10 : f32 to vector<8x1xf32>
    %22 = arith.addf %20, %21 : vector<8x1xf32>
    %23 = math.rsqrt %22 : vector<8x1xf32>
    %24 = vector.broadcast %23 : vector<8x1xf32> to vector<8x16xf32>
    %25 = arith.mulf %15, %24 : vector<8x16xf32>
    %c48 = arith.constant 48 : index
    %c0_11 = arith.constant 0 : index
    %26 = vector.load %arg3[%c48, %c0_11] : memref<224x32xbf16, #tpu.memory_space<vmem>>, vector<1x16xbf16>
    %27 = arith.extf %26 : vector<1x16xbf16> to vector<1x16xf32>
    %28 = vector.broadcast %27 : vector<1x16xf32> to vector<8x16xf32>
    %29 = arith.mulf %25, %28 : vector<8x16xf32>
    %c64 = arith.constant 64 : index
    %c0_12 = arith.constant 0 : index
    %30 = vector.load %arg3[%c64, %c0_12] : memref<224x32xbf16, #tpu.memory_space<vmem>>, vector<1x16xbf16>
    %31 = arith.extf %30 : vector<1x16xbf16> to vector<1x16xf32>
    %32 = vector.broadcast %31 : vector<1x16xf32> to vector<8x16xf32>
    %33 = arith.addf %29, %32 : vector<8x16xf32>
    %34 = math.tanh %33 : vector<8x16xf32>
    %35 = arith.truncf %34 : vector<8x16xf32> to vector<8x16xbf16>
    %c80 = arith.constant 80 : index
    %c0_13 = arith.constant 0 : index
    %36 = vector.load %arg3[%c80, %c0_13] : memref<224x32xbf16, #tpu.memory_space<vmem>>, vector<16x32xbf16>
    %cst_14 = arith.constant dense<0.000000e+00> : vector<8x32xf32>
    %37 = tpu.matmul %35, %36, %cst_14 {dimension_numbers = #tpu.dot_dimension_numbers<[1], [0], [0], [1], [0, 0, 1, 1], [], []>} : vector<8x16xbf16>, vector<16x32xbf16>, vector<8x32xf32> -> vector<8x32xf32>
    %c96 = arith.constant 96 : index
    %c0_15 = arith.constant 0 : index
    %38 = vector.load %arg3[%c96, %c0_15] : memref<224x32xbf16, #tpu.memory_space<vmem>>, vector<16x32xbf16>
    %cst_16 = arith.constant dense<0.000000e+00> : vector<8x32xf32>
    %39 = tpu.matmul %3, %38, %cst_16 {dimension_numbers = #tpu.dot_dimension_numbers<[1], [0], [0], [1], [0, 0, 1, 1], [], []>} : vector<8x16xbf16>, vector<16x32xbf16>, vector<8x32xf32> -> vector<8x32xf32>
    %40 = arith.addf %37, %39 : vector<8x32xf32>
    %c112 = arith.constant 112 : index
    %c0_17 = arith.constant 0 : index
    %41 = vector.load %arg3[%c112, %c0_17] : memref<224x32xbf16, #tpu.memory_space<vmem>>, vector<1x32xbf16>
    %42 = arith.extf %41 : vector<1x32xbf16> to vector<1x32xf32>
    %43 = vector.broadcast %42 : vector<1x32xf32> to vector<8x32xf32>
    %44 = arith.addf %40, %43 : vector<8x32xf32>
    %cst_18 = arith.constant 0.000000e+00 : f32
    %45 = vector.broadcast %cst_18 : f32 to vector<8x32xf32>
    %46 = arith.maximumf %44, %45 : vector<8x32xf32>
    %47 = arith.truncf %46 : vector<8x32xf32> to vector<8x32xbf16>
    %c128 = arith.constant 128 : index
    %c0_19 = arith.constant 0 : index
    %48 = vector.load %arg3[%c128, %c0_19] : memref<224x32xbf16, #tpu.memory_space<vmem>>, vector<32x32xbf16>
    %cst_20 = arith.constant dense<0.000000e+00> : vector<8x32xf32>
    %49 = tpu.matmul %47, %48, %cst_20 {dimension_numbers = #tpu.dot_dimension_numbers<[1], [0], [0], [1], [0, 0, 1, 1], [], []>} : vector<8x32xbf16>, vector<32x32xbf16>, vector<8x32xf32> -> vector<8x32xf32>
    %c160 = arith.constant 160 : index
    %c0_21 = arith.constant 0 : index
    %50 = vector.load %arg3[%c160, %c0_21] : memref<224x32xbf16, #tpu.memory_space<vmem>>, vector<1x32xbf16>
    %51 = arith.extf %50 : vector<1x32xbf16> to vector<1x32xf32>
    %52 = vector.broadcast %51 : vector<1x32xf32> to vector<8x32xf32>
    %53 = arith.addf %49, %52 : vector<8x32xf32>
    %cst_22 = arith.constant 0.000000e+00 : f32
    %54 = vector.broadcast %cst_22 : f32 to vector<8x32xf32>
    %55 = arith.maximumf %53, %54 : vector<8x32xf32>
    %56 = arith.truncf %55 : vector<8x32xf32> to vector<8x32xbf16>
    %c176 = arith.constant 176 : index
    %c0_23 = arith.constant 0 : index
    %57 = vector.load %arg3[%c176, %c0_23] : memref<224x32xbf16, #tpu.memory_space<vmem>>, vector<32x32xbf16>
    %cst_24 = arith.constant dense<0.000000e+00> : vector<8x32xf32>
    %58 = tpu.matmul %56, %57, %cst_24 {dimension_numbers = #tpu.dot_dimension_numbers<[1], [0], [0], [1], [0, 0, 1, 1], [], []>} : vector<8x32xbf16>, vector<32x32xbf16>, vector<8x32xf32> -> vector<8x32xf32>
    %c208 = arith.constant 208 : index
    %c0_25 = arith.constant 0 : index
    %59 = vector.load %arg3[%c208, %c0_25] : memref<224x32xbf16, #tpu.memory_space<vmem>>, vector<1x32xbf16>
    %60 = arith.extf %59 : vector<1x32xbf16> to vector<1x32xf32>
    %61 = vector.broadcast %60 : vector<1x32xf32> to vector<8x32xf32>
    %62 = arith.addf %58, %61 : vector<8x32xf32>
    %c0_26 = arith.constant 0 : index
    %c0_27 = arith.constant 0 : index
    %63 = vector.load %arg4[%c0_26, %c0_27] : memref<8x32xf32, #tpu.memory_space<vmem>>, vector<8x32xf32>
    tpu.vector_store %arg4[%c0_26, %c0_27], %62 {strides = array<i32>} : memref<8x32xf32, #tpu.memory_space<vmem>>, vector<8x32xf32>,
    return
  }
  func.func @transform_0(%arg0: i32) -> (i32, i32) {
    %c0_i32 = arith.constant 0 : i32
    %c0_i32_0 = arith.constant 0 : i32
    return %arg0, %c0_i32 : i32, i32
  }
  func.func @transform_1(%arg0: i32) -> (i32, i32) {
    %c0_i32 = arith.constant 0 : i32
    %c0_i32_0 = arith.constant 0 : i32
    return %arg0, %c0_i32 : i32, i32
  }
  func.func @transform_2(%arg0: i32) -> (i32, i32) {
    %c0_i32 = arith.constant 0 : i32
    %c0_i32_0 = arith.constant 0 : i32
    %c0_i32_1 = arith.constant 0 : i32
    return %c0_i32, %c0_i32_0 : i32, i32
  }
  func.func @transform_3(%arg0: i32) -> (i32, i32) {
    %c0_i32 = arith.constant 0 : i32
    %c0_i32_0 = arith.constant 0 : i32
    return %arg0, %c0_i32 : i32, i32
  }
}

</mosaic_0001>

<bundles_post_ra>
// kernel: tpu_custom_call.1
= control target key start
LH: loop header
LB: loop body
LE: loop exit
PB: predicated region body
PF: predicated region fallthrough
CT: control target
= control target key end

     0   :  { %v476_v1 = vmov 0.0   ;;  %vm477_vm0 = vmmov 0   ;;  %vm42_vm1 = vcmask 261120   ;;  %s593_s0 = inlined_call_operand.vmem [shape: f32[8,32], index: 0, kind: input, shape index: {}]   ;;  %s594_s1 = inlined_call_operand.vmem [shape: f32[8,16], index: 1, kind: input, shape index: {}]   ;;  %s595_s2 = inlined_call_operand.vmem [shape: bf16[224,32], index: 2, kind: input, shape index: {}]   ;;  %s596_s3 = inlined_call_operand.hbm [shape: f32[8,32], index: 3, kind: output, shape index: {}]  }
   0x1   :  { %v440_v0 = vld [vmem:[%s595_s2] sm:$0xff]   ;;  %401 = vmatprep.subr.bf16.mxu0 %v476_v1  ;;  %409 = vmatprep.subr.bf16.mxu1 %v476_v1  ;;  %v441_v2 = vld [vmem:[%s595_s2 + $0x8] sm:$0xff]  }
   0x2   :  { %402 = vmatpush3.bf16.msra.mxu0 %v440_v0  ;;  %405 = vmatprep.mubr.msk.bf16.mxu0 %vm477_vm0, %v476_v1  ;;  %v16_v3 = vld [vmem:[%s593_s0] sm:$0xff] }
   0x3   :  { %403 = vmatprep.subr.bf16.mxu0 %v476_v1  ;;  %411 = vmatprep.mubr.msk.bf16.mxu1 %vm477_vm0, %v476_v1  ;;  %v17_v4 = vpack.c.bf16 %v16_v3, %v16_v3 }
   0x6   :  { %404 = vmatpush3.bf16.msra.mxu0 %v441_v2 }
   0x7   :  { %421 = vmatprep.subr.bf16.mxu0 %v476_v1 }
   0x8   :  { %8 = vsyncpa [#allocation3], 0  ;;  %v26_v5 = vlaneseq  ;;  %v24_v7 = vld [vmem:[%s595_s2 + $0x10] sm:$0x1]  ;;  %vm86_vm2 = vcmask 130048   ;;  %v18_v23 = vld [vmem:[%s594_s1] sm:$0xff] }
   0x9   :  { %406 = vmatmul.mubr.msk.bf16.vlgmr.msra.gmra.mrb[0].mxu0 %vm42_vm1, %v17_v4  ;;  %v25_v8 = vunpack.c.l.bf16 %v24_v7  ;;  %v442_v22 = vld [vmem:[%s595_s2 + $0x30] sm:$0xff]   ;;  %v19_v24 = vpack.c.bf16 %v18_v23, %v18_v23  ;;  %v443_v25 = vld [vmem:[%s595_s2 + $0x28] sm:$0xff]   ;;  %v101_v29 = vld [vmem:[%s595_s2 + $0x18] sm:$0x1]  ;;  %s478_s15 = smov [#allocation2]  }
   0xa   :  { %425 = vmatprep.mubr.msk.bf16.mxu0 %vm477_vm0, %v476_v1  ;;  %v27_v6 = vshrl.u32 %v26_v5, 7  ;;  %410 = vmatpush3.bf16.msra.mxu1 %v442_v22  ;;  %v108_v30 = vld [vmem:[%s595_s2 + $0x20] sm:$0x1]  ;;  %v102_v31 = vunpack.c.l.bf16 %v101_v29  ;;  %v445_v46 = vld [vmem:[%s595_s2 + $0x48] sm:$0xff]   ;;  %v446_v47 = vld [vmem:[%s595_s2 + $0x58] sm:$0xff]   ;;  %s367_s16 = sshll.u32 %s478_s15, 4  ;;  %s368_s16 = int_to_ptr.vmem [resolvable:$true] %s367_s16 }
   0xb   :  { %415 = vmatprep.subr.bf16.mxu1 %v476_v1  ;;  %v109_v32 = vunpack.c.l.bf16 %v108_v30  ;;  %v444_v45 = vld [vmem:[%s595_s2 + $0x40] sm:$0xff]   ;;  %v219_v48 = vld [vmem:[%s595_s2 + $0x38] sm:$0x1]  ;;  %v232_v60 = vld [vmem:[%s595_s2 + $0x50] sm:$0x1]  ;;  %s452_s17 = scalar_lea.vmem %s368_s16, 128  ;;  %p457_p1 = scmp.lt.s32.totalorder %s368_s16, %s368_s16 }
   0xc   :  { %v522_v9 = vsub.s32 0, %v27_v6  ;;  %422 = vmatpush3.bf16.msra.mxu0 %v444_v45  ;;  %v220_v49 = vunpack.c.l.bf16 %v219_v48  ;;  %v447_v59 = vld [vmem:[%s595_s2 + $0x60] sm:$0xff]   ;;  %v233_v61 = vunpack.c.l.bf16 %v232_v60  ;;  %v299_v6 = vld [vmem:[%s595_s2 + $0x68] sm:$0x1]  ;;  %p453_p0 = scmp.ne.s32.totalorder %s368_s16, %s452_s17  ;;  %p458_p2 = scmp.lt.s32.totalorder %s452_s17, %s452_s17 }
   0xd   :  { %412 = vmatmul.mubr.msk.bf16.vlgmr.msra.gmra.mrb[0].mxu1 %vm86_vm2, %v19_v24  ;;  %423 = vmatprep.subr.bf16.mxu0 %v476_v1  ;;  %v300_v7 = vunpack.c.l.bf16 %v299_v6 }
   0xe   :  { %v29_v10 = vrot.slane %v25_v8, %v522_v9  ;;  %416 = vmatpush3.bf16.msra.mxu1 %v443_v25  ;;  %417 = vmatprep.mubr.msk.bf16.mxu1 %vm477_vm0, %v476_v1  ;;  %v106_v33 = vrot.slane %v102_v31, %v522_v9  ;;  %v113_v36 = vrot.slane %v109_v32, %v522_v9  ;;  %p459_p3 = por %p458_p2, %p457_p1 }
   0xf   :  { %429 = vmatprep.subr.bf16.mxu1 %v476_v1  ;;  %v224_v50 = vrot.slane %v220_v49, %v522_v9  ;;  %v237_v62 = vrot.slane %v233_v61, %v522_v9  ;;  %v304_v8 = vrot.slane %v300_v7, %v522_v9 }
  0x10   :  { %424 = vmatpush3.bf16.msra.mxu0 %v445_v46  ;;  %p460_p4 = pnand %p459_p3, %p453_p0 }
  0xdc   :  { %v80_v11 = vpop.f32.mrb[0].mxu0 }
  0xdd   :  { %v81_v12 = vadd.f32 %v80_v11, %v29_v10  ;;  %v407_v13 = vpop.f32.mrb[1].mxu0 }
  0xde   :  { %v83_v14 = vpop.f32.mrb[2].mxu0 }
  0xdf   :  { %v408_v15 = vpop.f32.mrb[3].mxu0  ;;  %v87_v16 = vsel %vm86_vm2, %v81_v12, 0.0 }
  0xe0   :  { %88 = vadd.xlane.f32.xlu0 %v87_v16  ;;  %v164_v41 = vpop.f32.mrb[0].mxu1 }
  0xe1   :  { %v413_v42 = vpop.f32.mrb[1].mxu1 }
  0xe2   :  { %v167_v43 = vpop.f32.mrb[2].mxu1 }
  0xe3   :  { %v414_v44 = vpop.f32.mrb[3].mxu1 }
 0x16d   :  { %v89_v17 = vpop.xlane.xlu0 %88 }
 0x16e   :  { %v91_v18 = vmul.f32 0.0625, %v89_v17 }
 0x170   :  { %v92_v19 = vsub.f32 %v81_v12, %v91_v18 }
 0x172   :  { %v93_v20 = vmul.f32 %v92_v19, %v92_v19 }
 0x174   :  { %v94_v21 = vsel %vm86_vm2, %v93_v20, 0.0 }
 0x175   :  { %95 = vadd.xlane.f32.xlu0 %v94_v21 }
 0x202   :  { %v96_v26 = vpop.xlane.xlu0 %95 }
 0x203   :  { %v97_v27 = vmul.f32 0.0625, %v96_v26 }
 0x205   :  { %v98_v28 = vadd.f32 1e-05, %v97_v27 }
 0x207   :  { %448 = vrsqrt.f32 %v98_v28 }
 0x211   :  { %v449_v34 = vpop.eup %448 }
 0x212   :  { %v100_v35 = vmul.f32 %v449_v34, %v92_v19 }
 0x214   :  { %v107_v37 = vmul.f32 %v106_v33, %v100_v35 }
 0x216   :  { %v114_v38 = vadd.f32 %v113_v36, %v107_v37 }
 0x218   :  { %450 = vtanh.f32 %v114_v38 }
 0x222   :  { %v451_v39 = vpop.eup %450 }
 0x223   :  { %v116_v40 = vpack.c.bf16 %v451_v39, %v451_v39 }
 0x225   :  { %418 = vmatmul.mubr.msk.bf16.vlgmr.msra.gmra.mrb[4].mxu1 %vm86_vm2, %v116_v40 }
 0x226   :  { %433 = vmatprep.mubr.msk.bf16.mxu1 %vm477_vm0, %v476_v1  ;;  %430 = vmatpush3.bf16.msra.mxu1 %v446_v47 }
 0x227   :  { %431 = vmatprep.subr.bf16.mxu1 %v476_v1 }
 0x22a   :  { %432 = vmatpush3.bf16.msra.mxu1 %v447_v59 }
 0x2f8   :  { %v213_v51 = vpop.f32.mrb[4].mxu1 }
 0x2f9   :  { %v214_v52 = vadd.f32 %v213_v51, %v164_v41  ;;  %v419_v53 = vpop.f32.mrb[5].mxu1 }
 0x2fa   :  { %v216_v54 = vpop.f32.mrb[6].mxu1 }
 0x2fb   :  { %v225_v55 = vadd.f32 %v224_v50, %v214_v52  ;;  %v420_v56 = vpop.f32.mrb[7].mxu1 }
 0x2fd   :  { %v226_v57 = vmax.f32 %v225_v55, 0.0 }
 0x2ff   :  { %v227_v58 = vpack.c.bf16 %v226_v57, %v226_v57 }
 0x301   :  { %426 = vmatmul.mubr.msk.bf16.vlgmr.msra.gmra.mrb[4].mxu0 %vm42_vm1, %v227_v58 }
 0x3d4   :  { %v287_v63 = vpop.f32.mrb[4].mxu0 }
 0x3d5   :  { %v288_v0 = vadd.f32 %v287_v63, %v237_v62  ;;  %v427_v1 = vpop.f32.mrb[5].mxu0 }
 0x3d6   :  { %v290_v2 = vpop.f32.mrb[6].mxu0 }
 0x3d7   :  { %v293_v3 = vmax.f32 %v288_v0, 0.0  ;;  %v428_v4 = vpop.f32.mrb[7].mxu0 }
 0x3d9   :  { %v294_v5 = vpack.c.bf16 %v293_v3, %v293_v3 }
 0x3db   :  { %434 = vmatmul.mubr.msk.bf16.vlgmr.msra.gmra.mrb[8].mxu1 %vm42_vm1, %v294_v5 }
 0x4ae   :  { %v354_v10 = vpop.f32.mrb[8].mxu1 }
 0x4af   :  { %v355_v11 = vadd.f32 %v354_v10, %v304_v8  ;;  %v435_v12 = vpop.f32.mrb[9].mxu1 }
 0x4b0   :  { %v357_v13 = vpop.f32.mrb[10].mxu1 }
 0x4b1   :  { %360 = vst.msk [vmem:[#allocation2] sm:$0xff] %vm42_vm1, %v355_v11  ;;  %v436_v14 = vpop.f32.mrb[11].mxu1 }
 0x4b2   :  { %463 = shalt.err (!%p460_p4)
}
 0x4b3   :  { %s464_s0 = scalar_lea.hbm %s596_s3, 128 }
 0x4b4   :  { %p465_p5 = scmp.ne.s32.totalorder %s596_s3, %s464_s0  ;;  %p468_p6 = scmp.lt.u32.totalorder %s464_s0, %s596_s3 }
 0x4b6   :  { %p470_p7 = pnand %p468_p6, %p465_p5 }
 0x4b8   :  { %473 = shalt.err (!%p470_p7)
}
 0x4b9   :  { %370 = dma.vmem_to_hbm [thread:$0]  %s368_s16, 128, %s596_s3, [#allocation3]  }
 0x4ba   :  { %474 = dma.done.wait [#allocation3], 128  }
 0x4bb   :  { %475 = vsyncadd [#allocation3], 4294967168 }
 0x4bc   :  { %374 = vsyncpa [#allocation3], 1 }

</bundles_post_ra>
